<compile_context>
chip_gen: v6e
topology: v6e:2x2x1
jax: 0.10.0
libtpu: 0.0.40
codegen_flags: <defaults>
</compile_context>

<pallas_src>
import jax
import jax.numpy as jnp
from jax.experimental import pallas as pl
from jax.experimental.pallas import tpu as pltpu


def _hbm_copy_kernel(x_hbm_ref, o_hbm_ref, copy_sem):
    # Single HBM -> HBM DMA of the whole array.  Purely DMA-bound: no VMEM
    # staging buffers, no grid, no masked stores, no pipeline overhead.
    cp = pltpu.make_async_copy(x_hbm_ref, o_hbm_ref, copy_sem)
    cp.start()
    cp.wait()


def vit_identity_pallas(images_nchw: jax.Array) -> jax.Array:
    """Identity pass over the input images as one HBM->HBM Pallas DMA.

    The input is left in place (memory_space=pl.ANY) and copied directly to
    the output HBM buffer with a single async copy; this is the minimal-cost
    form of the identity kernel (one HBM read + one HBM write, nothing else).
    """
    nbytes = images_nchw.size * jnp.dtype(images_nchw.dtype).itemsize
    return pl.pallas_call(
        _hbm_copy_kernel,
        out_shape=jax.ShapeDtypeStruct(images_nchw.shape, images_nchw.dtype),
        in_specs=[pl.BlockSpec(memory_space=pl.ANY)],
        out_specs=pl.BlockSpec(memory_space=pl.ANY),
        scratch_shapes=[pltpu.SemaphoreType.DMA(())],
        cost_estimate=pl.CostEstimate(
            flops=0, transcendentals=0, bytes_accessed=2 * nbytes),
    )(images_nchw)


def my_vit_forward(images_nchw: jax.Array):
    """Exact semantic match of myViT.forward: the body is `pass` -> None.

    No kernel is launched here (the identity copy was pure dead work and
    would be DCE'd under jit anyway).  The Pallas path lives in
    vit_identity_pallas and is validated separately in __main__.
    """
    del images_nchw
    # TODO(synk): insert real patch-embed / attention / MLP Pallas kernels
    # here once the reference module defines them.
    return None


if __name__ == "__main__":
    key = jax.random.PRNGKey(0)
    # Small NCHW image batch consistent with a ViT-style input.
    images = jax.random.normal(key, (2, 4, 16, 16), dtype=jnp.float32)

    # Run the Pallas identity (HBM->HBM DMA) kernel once and validate it.
    out = vit_identity_pallas(images)
    jax.block_until_ready(out)
    assert out.shape == images.shape
    assert out.dtype == images.dtype
    assert jnp.allclose(out, images), "Pallas identity kernel mismatch"

    # Forward matches the PyTorch stub exactly (returns None).
    result = my_vit_forward(images)
    assert result is None

    print("KERNEL_OK")
</pallas_src>

<mosaic_0001>
module attributes {stable_mosaic.version = 11 : i64} {
  func.func @_hbm_copy_kernel(%arg0: memref<2x4x16x16xf32, #tpu.memory_space<any>>, %arg1: memref<2x4x16x16xf32, #tpu.memory_space<any>>, %arg2: memref<!tpu.dma_semaphore, #tpu.memory_space<semaphore_mem>>) attributes {dimension_semantics = [], scalar_prefetch = 0 : i64, scratch_operands = 1 : i64, tpu.core_type = #tpu.core_type<tc>} {
    tpu.enqueue_dma source(%arg0 : memref<2x4x16x16xf32, #tpu.memory_space<any>>) target(%arg1 : memref<2x4x16x16xf32, #tpu.memory_space<any>>) target_semaphore(%arg2 : memref<!tpu.dma_semaphore, #tpu.memory_space<semaphore_mem>>)
    tpu.wait_dma2 semaphore(%arg2 : memref<!tpu.dma_semaphore, #tpu.memory_space<semaphore_mem>>) src(%arg0 : memref<2x4x16x16xf32, #tpu.memory_space<any>>) dst(%arg1 : memref<2x4x16x16xf32, #tpu.memory_space<any>>)
    return
  }
}

</mosaic_0001>

<bundles_post_ra>
// kernel: tpu_custom_call.1
= control target key start
LH: loop header
LB: loop body
LE: loop exit
PB: predicated region body
PF: predicated region fallthrough
CT: control target
= control target key end

     0   :  { %s30_s6 = smov [#allocation2]   ;;  %s31_s7 = smov 131072   ;;  %s49_s0 = inlined_call_operand.hbm [shape: f32[2,4,16,16], index: 0, kind: input, shape index: {}]   ;;  %s50_s1 = inlined_call_operand.hbm [shape: f32[2,4,16,16], index: 1, kind: output, shape index: {}]  }
   0x1   :  { %s32_s8 = smov 0  }
   0x2   :  { %12 = dma.general %s49_s0, 2048, %s50_s1, %s30_s6, %s31_s7, [#allocation4], %s32_s8, 0  }
   0x3   :  { %28 = dma.done.wait [#allocation2], 2048 }
   0x4   :  { %29 = vsyncadd [#allocation2], 4294965248 }
   0x5   :  { %18 = vsyncmov [#allocation2] }
   0x8   :  { %s19_s13 = vpop.sfrf %18 }
   0x9   :  { %p24_p0 = scmp.ne.s32.totalorder %s19_s13, 0 }
   0xb   :  { %23 = shalt.err (%p24_p0)  }

</bundles_post_ra>
